<compile_context>
chip_gen: v5e
topology: v5e:2x2
jax: 0.10.0
libtpu: 0.0.40
codegen_flags: <defaults>
</compile_context>

<pallas_src>
import functools

import jax
import jax.numpy as jnp
from jax.experimental import pallas as pl
from jax.experimental.pallas import tpu as pltpu

D_IN, D_H1, D_H2, D_OUT = 2, 84, 50, 2
K_IN = 8          # input features padded to one f32 sublane tile
H_PAD = 128       # hidden features padded to one lane tile
DEFAULT_TILE_M = 1024


def _mlp_kernel(x_ref, w1_ref, w2_ref, w3_ref, b_ref, o_ref):
    # x: (TILE_M, 8); w1: (8,128); w2, w3: (128,128); b: (8,128); o: (TILE_M, 2)
    x = x_ref[...]
    h1 = jnp.maximum(
        jnp.dot(x, w1_ref[...], preferred_element_type=jnp.float32) + b_ref[0:1, :],
        0.0)
    h2 = jnp.maximum(
        jnp.dot(h1, w2_ref[...], preferred_element_type=jnp.float32) + b_ref[1:2, :],
        0.0)
    y = jnp.dot(h2, w3_ref[...], preferred_element_type=jnp.float32) + b_ref[2:3, :]
    o_ref[...] = y[:, :D_OUT]          # store only the 2 real output lanes


def _pad2(a, rows, cols):
    return jnp.pad(a, ((0, rows - a.shape[0]), (0, cols - a.shape[1])))


def pack_params(params):
    """One-time padding/packing of SimpleNet params for the kernel (not in the hot path)."""
    (w1, b1), (w2, b2), (w3, b3) = params
    w1p = _pad2(w1.astype(jnp.float32), K_IN, H_PAD)      # (8, 128)
    w2p = _pad2(w2.astype(jnp.float32), H_PAD, H_PAD)     # (128, 128)
    w3p = _pad2(w3.astype(jnp.float32), H_PAD, H_PAD)     # (128, 128)
    bp = jnp.zeros((8, H_PAD), jnp.float32)
    bp = bp.at[0, :D_H1].set(b1.astype(jnp.float32))
    bp = bp.at[1, :D_H2].set(b2.astype(jnp.float32))
    bp = bp.at[2, :D_OUT].set(b3.astype(jnp.float32))
    return w1p, w2p, w3p, bp


def _round_up(n, m):
    return ((n + m - 1) // m) * m


@functools.partial(jax.jit, static_argnames=("tile_m",))
def simplenet_forward(x, packed_params, tile_m=DEFAULT_TILE_M):
    """Exact SimpleNet.forward semantics: x.view(-1, 2) -> fc1/relu -> fc2/relu -> fc3."""
    w1p, w2p, w3p, bp = packed_params
    x2 = x.reshape(-1, D_IN).astype(jnp.float32)          # x.view(-1, 2)
    n = x2.shape[0]
    tm = min(tile_m, _round_up(n, 8))
    n_pad = _round_up(n, tm)
    xp = _pad2(x2, n_pad, K_IN)                           # (n_pad, 8): rows/lanes zero-padded

    out = pl.pallas_call(
        _mlp_kernel,
        out_shape=jax.ShapeDtypeStruct((n_pad, D_OUT), jnp.float32),
        grid_spec=pltpu.PrefetchScalarGridSpec(
            num_scalar_prefetch=0,
            grid=(n_pad // tm,),
            in_specs=[
                pl.BlockSpec((tm, K_IN), lambda i: (i, 0)),        # x tile (pipelined)
                pl.BlockSpec((K_IN, H_PAD), lambda i: (0, 0)),     # w1, VMEM-resident
                pl.BlockSpec((H_PAD, H_PAD), lambda i: (0, 0)),    # w2, VMEM-resident
                pl.BlockSpec((H_PAD, H_PAD), lambda i: (0, 0)),    # w3, VMEM-resident
                pl.BlockSpec((8, H_PAD), lambda i: (0, 0)),        # packed biases, resident
            ],
            out_specs=pl.BlockSpec((tm, D_OUT), lambda i: (i, 0)), # narrow output tile
        ),
        compiler_params=pltpu.CompilerParams(
            dimension_semantics=("parallel",)),
    )(xp, w1p, w2p, w3p, bp)
    return out if n == n_pad else out[:n]


def init_params(key):
    """Deterministic init mirroring PyTorch nn.Linear defaults:
    U(-1/sqrt(fan_in), 1/sqrt(fan_in)) for both weight and bias.
    Weights are produced directly in (in, out) layout."""
    def linear(k, fan_in, fan_out):
        kw, kb = jax.random.split(k)
        bound = 1.0 / jnp.sqrt(float(fan_in))
        w = jax.random.uniform(kw, (fan_in, fan_out), jnp.float32, -bound, bound)
        b = jax.random.uniform(kb, (fan_out,), jnp.float32, -bound, bound)
        return w, b

    k1, k2, k3 = jax.random.split(key, 3)
    return (
        linear(k1, D_IN, D_H1),
        linear(k2, D_H1, D_H2),
        linear(k3, D_H2, D_OUT),
    )


def _reference_forward(x, params):
    (w1, b1), (w2, b2), (w3, b3) = params
    h = x.reshape(-1, D_IN).astype(jnp.float32)
    h = jnp.maximum(h @ w1 + b1, 0.0)
    h = jnp.maximum(h @ w2 + b2, 0.0)
    return h @ w3 + b3


if __name__ == "__main__":
    key = jax.random.PRNGKey(0)
    k_params, k_x1, k_x2 = jax.random.split(key, 3)
    params = init_params(k_params)
    packed = pack_params(params)          # padded once; reused across forward calls

    # small batch of 8 samples with 2 features each (consistent with x.view(-1, 2))
    x = jax.random.normal(k_x1, (8, 2), dtype=jnp.float32)
    out = jax.block_until_ready(simplenet_forward(x, packed))
    ref = _reference_forward(x, params)
    assert out.shape == (8, 2)
    assert jnp.allclose(out, ref, atol=1e-5, rtol=1e-5)

    # exercise the batch grid (multiple tiles + row padding) at a small scale
    x_big = jax.random.normal(k_x2, (20, 2), dtype=jnp.float32)
    out_big = jax.block_until_ready(simplenet_forward(x_big, packed, tile_m=8))
    ref_big = _reference_forward(x_big, params)
    assert out_big.shape == (20, 2)
    assert jnp.allclose(out_big, ref_big, atol=1e-5, rtol=1e-5)

    print("KERNEL_OK")
</pallas_src>

<mosaic_0001>
module attributes {stable_mosaic.version = 11 : i64} {
  func.func @_mlp_kernel(%arg0: i32, %arg1: memref<8x8xf32, #tpu.memory_space<vmem>>, %arg2: memref<8x128xf32, #tpu.memory_space<vmem>>, %arg3: memref<128x128xf32, #tpu.memory_space<vmem>>, %arg4: memref<128x128xf32, #tpu.memory_space<vmem>>, %arg5: memref<8x128xf32, #tpu.memory_space<vmem>>, %arg6: memref<8x2xf32, #tpu.memory_space<vmem>>) attributes {dimension_semantics = [#tpu.dimension_semantics<parallel>], iteration_bounds = array<i64: 1>, scalar_prefetch = 0 : i64, scratch_operands = 0 : i64, tpu.core_type = #tpu.core_type<tc>, window_params = [{transform_indices = @transform_0, window_bounds = array<i64: 8, 8>}, {pipeline_mode = #tpu.pipeline_mode<synchronous>, transform_indices = @transform_1, window_bounds = array<i64: 8, 128>}, {pipeline_mode = #tpu.pipeline_mode<synchronous>, transform_indices = @transform_2, window_bounds = array<i64: 128, 128>}, {pipeline_mode = #tpu.pipeline_mode<synchronous>, transform_indices = @transform_3, window_bounds = array<i64: 128, 128>}, {pipeline_mode = #tpu.pipeline_mode<synchronous>, transform_indices = @transform_4, window_bounds = array<i64: 8, 128>}, {transform_indices = @transform_5, window_bounds = array<i64: 8, 2>}]} {
    %c0 = arith.constant 0 : index
    %c0_0 = arith.constant 0 : index
    %0 = vector.load %arg1[%c0, %c0_0] : memref<8x8xf32, #tpu.memory_space<vmem>>, vector<8x8xf32>
    %c0_1 = arith.constant 0 : index
    %c0_2 = arith.constant 0 : index
    %1 = vector.load %arg2[%c0_1, %c0_2] : memref<8x128xf32, #tpu.memory_space<vmem>>, vector<8x128xf32>
    %cst = arith.constant dense<0.000000e+00> : vector<8x128xf32>
    %2 = tpu.matmul %0, %1, %cst {dimension_numbers = #tpu.dot_dimension_numbers<[1], [0], [0], [1], [0, 0, 1, 1], [], []>} : vector<8x8xf32>, vector<8x128xf32>, vector<8x128xf32> -> vector<8x128xf32>
    %c0_3 = arith.constant 0 : index
    %c0_4 = arith.constant 0 : index
    %3 = vector.load %arg5[%c0_3, %c0_4] : memref<8x128xf32, #tpu.memory_space<vmem>>, vector<1x128xf32>
    %4 = vector.broadcast %3 : vector<1x128xf32> to vector<8x128xf32>
    %5 = arith.addf %2, %4 : vector<8x128xf32>
    %cst_5 = arith.constant 0.000000e+00 : f32
    %6 = vector.broadcast %cst_5 : f32 to vector<8x128xf32>
    %7 = arith.maximumf %5, %6 : vector<8x128xf32>
    %c0_6 = arith.constant 0 : index
    %c0_7 = arith.constant 0 : index
    %8 = vector.load %arg3[%c0_6, %c0_7] : memref<128x128xf32, #tpu.memory_space<vmem>>, vector<128x128xf32>
    %cst_8 = arith.constant dense<0.000000e+00> : vector<8x128xf32>
    %9 = tpu.matmul %7, %8, %cst_8 {dimension_numbers = #tpu.dot_dimension_numbers<[1], [0], [0], [1], [0, 0, 1, 1], [], []>} : vector<8x128xf32>, vector<128x128xf32>, vector<8x128xf32> -> vector<8x128xf32>
    %c1 = arith.constant 1 : index
    %c0_9 = arith.constant 0 : index
    %10 = vector.load %arg5[%c1, %c0_9] : memref<8x128xf32, #tpu.memory_space<vmem>>, vector<1x128xf32>
    %11 = vector.broadcast %10 : vector<1x128xf32> to vector<8x128xf32>
    %12 = arith.addf %9, %11 : vector<8x128xf32>
    %cst_10 = arith.constant 0.000000e+00 : f32
    %13 = vector.broadcast %cst_10 : f32 to vector<8x128xf32>
    %14 = arith.maximumf %12, %13 : vector<8x128xf32>
    %c0_11 = arith.constant 0 : index
    %c0_12 = arith.constant 0 : index
    %15 = vector.load %arg4[%c0_11, %c0_12] : memref<128x128xf32, #tpu.memory_space<vmem>>, vector<128x128xf32>
    %cst_13 = arith.constant dense<0.000000e+00> : vector<8x128xf32>
    %16 = tpu.matmul %14, %15, %cst_13 {dimension_numbers = #tpu.dot_dimension_numbers<[1], [0], [0], [1], [0, 0, 1, 1], [], []>} : vector<8x128xf32>, vector<128x128xf32>, vector<8x128xf32> -> vector<8x128xf32>
    %c2 = arith.constant 2 : index
    %c0_14 = arith.constant 0 : index
    %17 = vector.load %arg5[%c2, %c0_14] : memref<8x128xf32, #tpu.memory_space<vmem>>, vector<1x128xf32>
    %18 = vector.broadcast %17 : vector<1x128xf32> to vector<8x128xf32>
    %19 = arith.addf %16, %18 : vector<8x128xf32>
    %20 = vector.extract_strided_slice %19 {offsets = [0, 0], sizes = [8, 2], strides = [1, 1]} : vector<8x128xf32> to vector<8x2xf32>
    %c0_15 = arith.constant 0 : index
    %c0_16 = arith.constant 0 : index
    %21 = vector.load %arg6[%c0_15, %c0_16] : memref<8x2xf32, #tpu.memory_space<vmem>>, vector<8x2xf32>
    tpu.vector_store %arg6[%c0_15, %c0_16], %20 {strides = array<i32>} : memref<8x2xf32, #tpu.memory_space<vmem>>, vector<8x2xf32>,
    return
  }
  func.func @transform_0(%arg0: i32) -> (i32, i32) {
    %c0_i32 = arith.constant 0 : i32
    %c0_i32_0 = arith.constant 0 : i32
    return %arg0, %c0_i32 : i32, i32
  }
  func.func @transform_1(%arg0: i32) -> (i32, i32) {
    %c0_i32 = arith.constant 0 : i32
    %c0_i32_0 = arith.constant 0 : i32
    %c0_i32_1 = arith.constant 0 : i32
    return %c0_i32, %c0_i32_0 : i32, i32
  }
  func.func @transform_2(%arg0: i32) -> (i32, i32) {
    %c0_i32 = arith.constant 0 : i32
    %c0_i32_0 = arith.constant 0 : i32
    %c0_i32_1 = arith.constant 0 : i32
    return %c0_i32, %c0_i32_0 : i32, i32
  }
  func.func @transform_3(%arg0: i32) -> (i32, i32) {
    %c0_i32 = arith.constant 0 : i32
    %c0_i32_0 = arith.constant 0 : i32
    %c0_i32_1 = arith.constant 0 : i32
    return %c0_i32, %c0_i32_0 : i32, i32
  }
  func.func @transform_4(%arg0: i32) -> (i32, i32) {
    %c0_i32 = arith.constant 0 : i32
    %c0_i32_0 = arith.constant 0 : i32
    %c0_i32_1 = arith.constant 0 : i32
    return %c0_i32, %c0_i32_0 : i32, i32
  }
  func.func @transform_5(%arg0: i32) -> (i32, i32) {
    %c0_i32 = arith.constant 0 : i32
    %c0_i32_0 = arith.constant 0 : i32
    return %arg0, %c0_i32 : i32, i32
  }
}

</mosaic_0001>

<bundles_post_ra>
// kernel: simplenet_forward.1
= control target key start
LH: loop header
LB: loop body
LE: loop exit
PB: predicated region body
PF: predicated region fallthrough
CT: control target
= control target key end

     0   :  { %10 = vsyncpa [#allocation3], 0  ;;  %s284_s0 = inlined_call_operand.vmem [shape: f32[8,8], index: 0, kind: input, shape index: {}]   ;;  %s285_s1 = inlined_call_operand.vmem [shape: f32[8,128], index: 1, kind: input, shape index: {}]   ;;  %s286_s2 = inlined_call_operand.hbm [shape: f32[128,128], index: 2, kind: input, shape index: {}]   ;;  %s287_s3 = inlined_call_operand.hbm [shape: f32[128,128], index: 3, kind: input, shape index: {}]   ;;  %s288_s4 = inlined_call_operand.vmem [shape: f32[8,128], index: 4, kind: input, shape index: {}]   ;;  %s289_s5 = inlined_call_operand.vmem [shape: f32[8,2], index: 5, kind: output, shape index: {}]  }
   0x1   :  { %s20_s20 = sshll.u32 %s286_s2, 4  ;;  %s21_s20 = int_to_ptr.hbm [resolvable:$true] %s20_s20 }
   0x2   :  { %11 = vsyncpa [#allocation5], 0  ;;  %s226_s21 = smov [#allocation2]   ;;  %s33_s25 = sshll.u32 %s287_s3, 4  ;;  %s34_s25 = int_to_ptr.hbm [resolvable:$true] %s33_s25 }
   0x3   :  { %s22_s22 = sshll.u32 %s226_s21, 4  ;;  %s227_s26 = smov 128   ;;  %s23_s22 = int_to_ptr.vmem [resolvable:$true] %s22_s22 }
   0x4   :  { %s228_s27 = smov 8   ;;  %s229_s28 = smov [#allocation4]  }
   0x5   :  { %28 = dma.hbm_to_vmem [thread:$0]  %s21_s20, 2048, %s23_s22, [#allocation3], %s227_s26, %s227_s26, %s228_s27  }
   0x6   :  { %s35_s29 = sshll.u32 %s229_s28, 4  ;;  %s36_s29 = int_to_ptr.vmem [resolvable:$true] %s35_s29 }
   0x7   :  { %41 = dma.hbm_to_vmem [thread:$0]  %s34_s25, 2048, %s36_s29, [#allocation5], %s227_s26, %s227_s26, %s228_s27  }
   0x8   :  { %222 = dma.done.wait [#allocation3], 2048  }
   0x9   :  { %223 = vsyncadd [#allocation3], 4294965248 }
   0xa   :  { %224 = dma.done.wait [#allocation5], 2048  }
   0xb   :  { %225 = vsyncadd [#allocation5], 4294965248  ;;  %vm56_vm0 = vcmask 64512   ;;  %v53_v0 = vld [vmem:[%s285_s1] sm:$0xff]  ;;  %v96_v2 = vld [vmem:[#allocation2 + $0x78] sm:$0xff]  ;;  %vm158_vm1 = vcmask 15360  }
   0xc   :  { %v52_v1 = vld [vmem:[%s284_s0] sm:$0xff]  ;;  %75 = vmatpush.msra.mxu0 %v53_v0  ;;  %99 = vmatpush.msra.mxu1 %v96_v2  ;;  %v95_v3 = vld [vmem:[#allocation2 + $0x70] sm:$0xff]  ;;  %v94_v4 = vld [vmem:[#allocation2 + $0x68] sm:$0xff] }
   0xd   :  { %166 = vmatmul.msk.f32.vlgmr.msra.gmra.mxu0 %vm56_vm0, %v52_v1  ;;  %v93_v5 = vld [vmem:[#allocation2 + $0x60] sm:$0xff]  ;;  %v92_v6 = vld [vmem:[#allocation2 + $0x58] sm:$0xff]  ;;  %v91_v7 = vld [vmem:[#allocation2 + $0x50] sm:$0xff] }
   0xe   :  { %100 = vmatpush.msra.mxu1 %v95_v3  ;;  %v90_v8 = vld [vmem:[#allocation2 + $0x48] sm:$0xff]  ;;  %v89_v9 = vld [vmem:[#allocation2 + $0x40] sm:$0xff]  ;;  %v88_v10 = vld [vmem:[#allocation2 + $0x38] sm:$0xff] }
   0xf   :  { %v87_v11 = vld [vmem:[#allocation2 + $0x30] sm:$0xff]  ;;  %v86_v12 = vld [vmem:[#allocation2 + $0x28] sm:$0xff]  ;;  %v85_v13 = vld [vmem:[#allocation2 + $0x20] sm:$0xff] }
  0x10   :  { %101 = vmatpush.msra.mxu1 %v94_v4  ;;  %v84_v14 = vld [vmem:[#allocation2 + $0x18] sm:$0xff]  ;;  %v83_v15 = vld [vmem:[#allocation2 + $0x10] sm:$0xff]  ;;  %v82_v16 = vld [vmem:[#allocation2 + $0x8] sm:$0xff] }
  0x11   :  { %v81_v17 = vld [vmem:[#allocation2] sm:$0xff]  ;;  %v135_v18 = vld [vmem:[#allocation4 + $0x78] sm:$0xff]  ;;  %v134_v19 = vld [vmem:[#allocation4 + $0x70] sm:$0xff] }
  0x12   :  { %102 = vmatpush.msra.mxu1 %v93_v5  ;;  %138 = vmatpush.msra.mxu2 %v135_v18  ;;  %v133_v20 = vld [vmem:[#allocation4 + $0x68] sm:$0xff]  ;;  %v132_v21 = vld [vmem:[#allocation4 + $0x60] sm:$0xff]  ;;  %v131_v22 = vld [vmem:[#allocation4 + $0x58] sm:$0xff] }
  0x13   :  { %v130_v23 = vld [vmem:[#allocation4 + $0x50] sm:$0xff]  ;;  %v129_v24 = vld [vmem:[#allocation4 + $0x48] sm:$0xff]  ;;  %v128_v25 = vld [vmem:[#allocation4 + $0x40] sm:$0xff] }
  0x14   :  { %103 = vmatpush.msra.mxu1 %v92_v6  ;;  %139 = vmatpush.msra.mxu2 %v134_v19  ;;  %v127_v26 = vld [vmem:[#allocation4 + $0x38] sm:$0xff]  ;;  %v126_v27 = vld [vmem:[#allocation4 + $0x30] sm:$0xff]  ;;  %v125_v28 = vld [vmem:[#allocation4 + $0x28] sm:$0xff] }
  0x15   :  { %v124_v29 = vld [vmem:[#allocation4 + $0x20] sm:$0xff]  ;;  %v123_v30 = vld [vmem:[#allocation4 + $0x18] sm:$0xff]  ;;  %v122_v35 = vld [vmem:[#allocation4 + $0x10] sm:$0xff] }
  0x16   :  { %104 = vmatpush.msra.mxu1 %v91_v7  ;;  %140 = vmatpush.msra.mxu2 %v133_v20  ;;  %v171_v31 = vld [vmem:[%s288_s4] ss:$0 sm:$0xff]  ;;  %v121_v36 = vld [vmem:[#allocation4 + $0x8] sm:$0xff]  ;;  %v172_v38 = vld [vmem:[%s288_s4 + $0x1] ss:$0 sm:$0xff] }
  0x17   :  { %v120_v37 = vld [vmem:[#allocation4] sm:$0xff] }
  0x18   :  { %105 = vmatpush.msra.mxu1 %v90_v8  ;;  %141 = vmatpush.msra.mxu2 %v132_v21  ;;  %v173_v42 = vld [vmem:[%s288_s4 + $0x2] ss:$0 sm:$0xff] }
  0x1a   :  { %106 = vmatpush.msra.mxu1 %v89_v9  ;;  %142 = vmatpush.msra.mxu2 %v131_v22 }
  0x1c   :  { %107 = vmatpush.msra.mxu1 %v88_v10  ;;  %143 = vmatpush.msra.mxu2 %v130_v23 }
  0x1e   :  { %108 = vmatpush.msra.mxu1 %v87_v11  ;;  %144 = vmatpush.msra.mxu2 %v129_v24 }
  0x20   :  { %109 = vmatpush.msra.mxu1 %v86_v12  ;;  %145 = vmatpush.msra.mxu2 %v128_v25 }
  0x22   :  { %110 = vmatpush.msra.mxu1 %v85_v13  ;;  %146 = vmatpush.msra.mxu2 %v127_v26 }
  0x24   :  { %111 = vmatpush.msra.mxu1 %v84_v14  ;;  %147 = vmatpush.msra.mxu2 %v126_v27 }
  0x26   :  { %112 = vmatpush.msra.mxu1 %v83_v15  ;;  %148 = vmatpush.msra.mxu2 %v125_v28 }
  0x28   :  { %113 = vmatpush.msra.mxu1 %v82_v16  ;;  %149 = vmatpush.msra.mxu2 %v124_v29 }
  0x2a   :  { %114 = vmatpush.msra.mxu1 %v81_v17  ;;  %150 = vmatpush.msra.mxu2 %v123_v30 }
  0x2c   :  { %151 = vmatpush.msra.mxu2 %v122_v35 }
  0x2e   :  { %152 = vmatpush.msra.mxu2 %v121_v36 }
  0x30   :  { %153 = vmatpush.msra.mxu2 %v120_v37 }
  0x8a   :  { %v77_v32 = vpop.f32.mrf.mxu0 }
  0x8b   :  { %v78_v33 = vadd.f32 %v171_v31, %v77_v32 }
  0x8d   :  { %v80_v34 = vmax.f32 %v78_v33, 0.0 }
  0x8f   :  { %115 = vmatmul.f32.vlgmr.msra.gmra.mxu1 %v80_v34 }
 0x10c   :  { %v116_v39 = vpop.f32.mrf.mxu1 }
 0x10d   :  { %v117_v40 = vadd.f32 %v172_v38, %v116_v39 }
 0x10f   :  { %v119_v41 = vmax.f32 %v117_v40, 0.0 }
 0x111   :  { %154 = vmatmul.f32.vlgmr.msra.gmra.mxu2 %v119_v41 }
 0x194   :  { %v155_v43 = vpop.f32.mrf.mxu2 }
 0x195   :  { %v156_v44 = vadd.f32 %v173_v42, %v155_v43 }
 0x197   :  { %159 = vst.msk [vmem:[%s289_s5] sm:$0xff] %vm158_vm1, %v156_v44 }
 0x198   :  { %164 = vsyncpa [#allocation3], 1 }
 0x199   :  { %165 = vsyncpa [#allocation5], 1 }

</bundles_post_ra>
